<compile_context>
chip_gen: v6e
topology: v6e:2x2x1
jax: 0.10.0
libtpu: 0.0.40
codegen_flags: <defaults>
</compile_context>

<pallas_src>
import functools

import jax
import jax.numpy as jnp
from jax.experimental import pallas as pl
from jax.experimental.pallas import tpu as pltpu

_LANE = 128
_SUBLANE = 8


def _pbq_kernel(x_ref, w1_ref, b1_ref, w2_ref, b2_ref, out_ref, *, scale, num_q):
    # x_ref:  (D, TB)      input (state||action) transposed, batch along lanes
    # w1_ref: (KHp, D)     fused layer-1 weight (ensemble folded into rows)
    # b1_ref: (KHp, 1)
    # w2_ref: (Kp, KHp)    block-diagonal layer-2 weight (row k = member k)
    # b2_ref: (Kp, 1)
    # out_ref:(1, TB)      lane-dense result row

    # Layer 1 for all K members at once (single MXU pass, fused state/action contraction).
    h = jnp.dot(w1_ref[...], x_ref[...], preferred_element_type=jnp.float32)
    h = jnp.maximum(h + b1_ref[...], 0.0)                              # (KHp, TB)

    # Layer 2: per-member dot via block-diagonal weight.  Rows >= num_q are exactly 0.
    q = jnp.dot(w2_ref[...], h, preferred_element_type=jnp.float32) + b2_ref[...]  # (Kp, TB)

    # Ensemble statistics over sublanes: two-pass mean / centered variance (ddof=1).
    kf = jnp.float32(num_q)
    mean = jnp.sum(q, axis=0, keepdims=True) / kf                      # (1, TB)
    member = jax.lax.broadcasted_iota(jnp.int32, q.shape, dimension=0)
    centered = jnp.where(member < num_q, q - mean, 0.0)
    var = jnp.sum(centered * centered, axis=0, keepdims=True) / (kf - 1.0)
    out_ref[...] = mean - jnp.float32(scale) * jnp.sqrt(var)           # (1, TB)


def pack_pb_q_params(params):
    """One-time repack of stacked ensemble weights into MXU/lane-friendly layouts.

    Call once per parameter update, NOT per forward (hot-path hygiene per review).
    Returns (w1t, b1col, w2bdt, b2col, num_q).
    """
    w1, b1, w2, b2 = params                 # [K,D,H], [K,1,H], [K,H,1], [K,1,1]
    K, D, H = w1.shape
    f32 = jnp.float32
    KH = K * H
    KHp = pl.cdiv(KH, _LANE) * _LANE        # fused hidden rows, padded to lane multiple
    Kp = max(_SUBLANE, pl.cdiv(K, _SUBLANE) * _SUBLANE)   # ensemble rows, sublane-padded

    # Layer-1 weight transposed so batch is the minor (lane) dim: (KHp, D).
    w1t = jnp.transpose(w1, (1, 0, 2)).reshape(D, KH).T.astype(f32)    # (KH, D)
    w1t = jnp.pad(w1t, ((0, KHp - KH), (0, 0)))
    b1col = jnp.pad(b1.reshape(KH, 1).astype(f32), ((0, KHp - KH), (0, 0)))

    # Block-diagonal layer-2 weight, transposed: row k selects member k's hidden slice.
    member = jnp.repeat(jnp.arange(K), H)                              # (KH,)
    w2row = w2.reshape(1, KH).astype(f32)
    w2bdt = jnp.where(jnp.arange(Kp)[:, None] == member[None, :], w2row, 0.0)  # (Kp, KH)
    w2bdt = jnp.pad(w2bdt, ((0, 0), (0, KHp - KH)))                    # (Kp, KHp)
    b2col = jnp.pad(b2.reshape(K, 1).astype(f32), ((0, Kp - K), (0, 0)))       # (Kp, 1)
    return w1t, b1col, w2bdt, b2col, K


def pb_q_forward(state, action, packed_params, *, scale=2.0, batch_tile=1024):
    """Ensemble lower-confidence-bound Q value: mean_k Q_k(s,a) - scale * std_k Q_k(s,a)."""
    w1t, b1col, w2bdt, b2col, num_q = packed_params
    KHp, D = w1t.shape
    Kp = w2bdt.shape[0]
    B, S = state.shape
    A = action.shape[-1]
    assert D == S + A, (D, S, A)
    f32 = jnp.float32

    # --- batch padding / tiling (batch is the lane dim; "parallel" grid axis) ---
    batch_tile = max(_LANE, (batch_tile // _LANE) * _LANE)
    Bp0 = max(_LANE, pl.cdiv(B, _LANE) * _LANE)
    TB = min(batch_tile, Bp0)
    if Bp0 > _LANE and Bp0 <= TB:
        # mid-size batch: ensure >= 2 grid steps so both v7x TensorCores get work
        TB = pl.cdiv(Bp0 // 2, _LANE) * _LANE
    nb = pl.cdiv(Bp0, TB)
    Bp = nb * TB

    # Single fused input (no separate state/action dots), transposed to (D, Bp).
    x = jnp.concatenate([state, action], axis=-1).astype(f32)
    xT = jnp.pad(x, ((0, Bp - B), (0, 0))).T                           # (D, Bp)

    flops = 2 * Bp * KHp * (D + Kp)
    bytes_accessed = 4 * (Bp * D + KHp * D + KHp + Kp * KHp + Kp + Bp)

    kernel = functools.partial(_pbq_kernel, scale=scale, num_q=num_q)
    out = pl.pallas_call(
        kernel,
        out_shape=jax.ShapeDtypeStruct((1, Bp), jnp.float32),
        grid=(nb,),
        in_specs=[
            pl.BlockSpec((D, TB), lambda i: (0, i)),        # x^T batch tile
            pl.BlockSpec((KHp, D), lambda i: (0, 0)),       # W1^T, VMEM-resident
            pl.BlockSpec((KHp, 1), lambda i: (0, 0)),       # b1 column
            pl.BlockSpec((Kp, KHp), lambda i: (0, 0)),      # block-diag W2^T
            pl.BlockSpec((Kp, 1), lambda i: (0, 0)),        # b2 column
        ],
        out_specs=pl.BlockSpec((1, TB), lambda i: (0, i)),  # narrow lane-dense output
        compiler_params=pltpu.CompilerParams(
            dimension_semantics=("parallel",)),             # shard batch across TCs (v7x)
        cost_estimate=pl.CostEstimate(
            flops=flops, transcendentals=Bp, bytes_accessed=bytes_accessed),
    )(xT, w1t, b1col, w2bdt, b2col)

    return out[0, :B]                                       # (B,), matches torch shape


def make_params(key, q_num, state_dim, action_dim, hidden):
    """Deterministic synthetic ensemble weights (stacked along leading K axis)."""
    d = state_dim + action_dim
    k1, k2, k3, k4 = jax.random.split(key, 4)
    w1 = jax.random.normal(k1, (q_num, d, hidden), jnp.float32) * 0.1
    b1 = jax.random.normal(k2, (q_num, 1, hidden), jnp.float32) * 0.1
    w2 = jax.random.normal(k3, (q_num, hidden, 1), jnp.float32) * 0.1
    b2 = jax.random.normal(k4, (q_num, 1, 1), jnp.float32) * 0.1
    return w1, b1, w2, b2


def pb_q_reference(state, action, params, *, scale=2.0):
    """Plain-JAX reference mirroring the PyTorch forward."""
    w1, b1, w2, b2 = params
    x = jnp.concatenate([state, action], axis=-1).astype(jnp.float32)
    h = jnp.maximum(jnp.einsum("bd,kdh->kbh", x, w1) + b1, 0.0)        # (K, B, H)
    q = (jnp.einsum("kbh,kho->kbo", h, w2) + b2)[..., 0]               # (K, B)
    q = q.T                                                            # (B, K)
    mean = jnp.mean(q, axis=1)
    std = jnp.std(q, axis=1, ddof=1)                                   # torch.std default
    return mean - scale * std


if __name__ == "__main__":
    B, S, A, H, K = 8, 12, 4, 32, 5
    scale = 2.0

    key = jax.random.PRNGKey(0)
    k_state, k_action, k_params = jax.random.split(key, 3)
    state = jax.random.normal(k_state, (B, S), jnp.float32)
    action = jax.random.normal(k_action, (B, A), jnp.float32)
    params = make_params(k_params, K, S, A, H)

    packed = pack_pb_q_params(params)     # one-time repack, hoisted out of the hot path
    out = pb_q_forward(state, action, packed, scale=scale)
    out = jax.block_until_ready(out)

    ref = pb_q_reference(state, action, params, scale=scale)
    assert out.shape == (B,)
    assert jnp.allclose(out, ref, atol=1e-4, rtol=1e-4), (out, ref)

    print("KERNEL_OK")
</pallas_src>

<mosaic_0001>
module attributes {stable_mosaic.version = 11 : i64} {
  func.func @_pbq_kernel(%arg0: i32, %arg1: memref<16x128xf32, #tpu.memory_space<vmem>>, %arg2: memref<256x16xf32, #tpu.memory_space<vmem>>, %arg3: memref<256x1xf32, #tpu.memory_space<vmem>>, %arg4: memref<8x256xf32, #tpu.memory_space<vmem>>, %arg5: memref<8x1xf32, #tpu.memory_space<vmem>>, %arg6: memref<1x128xf32, #tpu.memory_space<vmem>>) attributes {dimension_semantics = [#tpu.dimension_semantics<parallel>], iteration_bounds = array<i64: 1>, scalar_prefetch = 0 : i64, scratch_operands = 0 : i64, tpu.core_type = #tpu.core_type<tc>, window_params = [{transform_indices = @transform_0, window_bounds = array<i64: 16, 128>}, {pipeline_mode = #tpu.pipeline_mode<synchronous>, transform_indices = @transform_1, window_bounds = array<i64: 256, 16>}, {pipeline_mode = #tpu.pipeline_mode<synchronous>, transform_indices = @transform_2, window_bounds = array<i64: 256, 1>}, {pipeline_mode = #tpu.pipeline_mode<synchronous>, transform_indices = @transform_3, window_bounds = array<i64: 8, 256>}, {pipeline_mode = #tpu.pipeline_mode<synchronous>, transform_indices = @transform_4, window_bounds = array<i64: 8, 1>}, {transform_indices = @transform_5, window_bounds = array<i64: 1, 128>}]} {
    %c0 = arith.constant 0 : index
    %c0_0 = arith.constant 0 : index
    %0 = vector.load %arg2[%c0, %c0_0] : memref<256x16xf32, #tpu.memory_space<vmem>>, vector<256x16xf32>
    %c0_1 = arith.constant 0 : index
    %c0_2 = arith.constant 0 : index
    %1 = vector.load %arg1[%c0_1, %c0_2] : memref<16x128xf32, #tpu.memory_space<vmem>>, vector<16x128xf32>
    %cst = arith.constant dense<0.000000e+00> : vector<256x128xf32>
    %2 = tpu.matmul %0, %1, %cst {dimension_numbers = #tpu.dot_dimension_numbers<[1], [0], [0], [1], [0, 0, 1, 1], [], []>} : vector<256x16xf32>, vector<16x128xf32>, vector<256x128xf32> -> vector<256x128xf32>
    %c0_3 = arith.constant 0 : index
    %c0_4 = arith.constant 0 : index
    %3 = vector.load %arg3[%c0_3, %c0_4] : memref<256x1xf32, #tpu.memory_space<vmem>>, vector<256x1xf32>
    %4 = vector.broadcast %3 : vector<256x1xf32> to vector<256x128xf32>
    %5 = arith.addf %2, %4 : vector<256x128xf32>
    %cst_5 = arith.constant 0.000000e+00 : f32
    %6 = vector.broadcast %cst_5 : f32 to vector<256x128xf32>
    %7 = arith.maximumf %5, %6 : vector<256x128xf32>
    %c0_6 = arith.constant 0 : index
    %c0_7 = arith.constant 0 : index
    %8 = vector.load %arg4[%c0_6, %c0_7] : memref<8x256xf32, #tpu.memory_space<vmem>>, vector<8x256xf32>
    %cst_8 = arith.constant dense<0.000000e+00> : vector<8x128xf32>
    %9 = tpu.matmul %8, %7, %cst_8 {dimension_numbers = #tpu.dot_dimension_numbers<[1], [0], [0], [1], [0, 0, 1, 1], [], []>} : vector<8x256xf32>, vector<256x128xf32>, vector<8x128xf32> -> vector<8x128xf32>
    %c0_9 = arith.constant 0 : index
    %c0_10 = arith.constant 0 : index
    %10 = vector.load %arg5[%c0_9, %c0_10] : memref<8x1xf32, #tpu.memory_space<vmem>>, vector<8x1xf32>
    %11 = vector.broadcast %10 : vector<8x1xf32> to vector<8x128xf32>
    %12 = arith.addf %9, %11 : vector<8x128xf32>
    %cst_11 = arith.constant dense<0.000000e+00> : vector<128xf32>
    %13 = vector.multi_reduction <add>, %12, %cst_11 [0] : vector<8x128xf32> to vector<128xf32>
    %14 = vector.shape_cast %13 : vector<128xf32> to vector<1x128xf32>
    %cst_12 = arith.constant 5.000000e+00 : f32
    %15 = vector.broadcast %cst_12 : f32 to vector<1x128xf32>
    %16 = arith.divf %14, %15 : vector<1x128xf32>
    %17 = tpu.iota {dimensions = array<i32: 0>} : vector<8x128xi32>
    %c5_i32 = arith.constant 5 : i32
    %18 = vector.broadcast %c5_i32 : i32 to vector<8x128xi32>
    %19 = arith.cmpi slt, %17, %18 : vector<8x128xi32>
    %20 = vector.broadcast %16 : vector<1x128xf32> to vector<8x128xf32>
    %21 = arith.subf %12, %20 : vector<8x128xf32>
    %cst_13 = arith.constant 0.000000e+00 : f32
    %22 = vector.broadcast %cst_13 : f32 to vector<8x128xf32>
    %23 = arith.select %19, %21, %22 : vector<8x128xi1>, vector<8x128xf32>
    %24 = arith.mulf %23, %23 : vector<8x128xf32>
    %cst_14 = arith.constant dense<0.000000e+00> : vector<128xf32>
    %25 = vector.multi_reduction <add>, %24, %cst_14 [0] : vector<8x128xf32> to vector<128xf32>
    %26 = vector.shape_cast %25 : vector<128xf32> to vector<1x128xf32>
    %cst_15 = arith.constant 5.000000e+00 : f32
    %cst_16 = arith.constant 1.000000e+00 : f32
    %27 = arith.subf %cst_15, %cst_16 : f32
    %28 = vector.broadcast %27 : f32 to vector<1x128xf32>
    %29 = arith.divf %26, %28 : vector<1x128xf32>
    %30 = math.sqrt %29 : vector<1x128xf32>
    %cst_17 = arith.constant 2.000000e+00 : f32
    %31 = vector.broadcast %cst_17 : f32 to vector<1x128xf32>
    %32 = arith.mulf %31, %30 : vector<1x128xf32>
    %33 = arith.subf %16, %32 : vector<1x128xf32>
    %c0_18 = arith.constant 0 : index
    %c0_19 = arith.constant 0 : index
    %34 = vector.load %arg6[%c0_18, %c0_19] : memref<1x128xf32, #tpu.memory_space<vmem>>, vector<1x128xf32>
    tpu.vector_store %arg6[%c0_18, %c0_19], %33 {strides = array<i32>} : memref<1x128xf32, #tpu.memory_space<vmem>>, vector<1x128xf32>,
    return
  }
  func.func @transform_0(%arg0: i32) -> (i32, i32) {
    %c0_i32 = arith.constant 0 : i32
    %c0_i32_0 = arith.constant 0 : i32
    return %c0_i32, %arg0 : i32, i32
  }
  func.func @transform_1(%arg0: i32) -> (i32, i32) {
    %c0_i32 = arith.constant 0 : i32
    %c0_i32_0 = arith.constant 0 : i32
    %c0_i32_1 = arith.constant 0 : i32
    return %c0_i32, %c0_i32_0 : i32, i32
  }
  func.func @transform_2(%arg0: i32) -> (i32, i32) {
    %c0_i32 = arith.constant 0 : i32
    %c0_i32_0 = arith.constant 0 : i32
    %c0_i32_1 = arith.constant 0 : i32
    return %c0_i32, %c0_i32_0 : i32, i32
  }
  func.func @transform_3(%arg0: i32) -> (i32, i32) {
    %c0_i32 = arith.constant 0 : i32
    %c0_i32_0 = arith.constant 0 : i32
    %c0_i32_1 = arith.constant 0 : i32
    return %c0_i32, %c0_i32_0 : i32, i32
  }
  func.func @transform_4(%arg0: i32) -> (i32, i32) {
    %c0_i32 = arith.constant 0 : i32
    %c0_i32_0 = arith.constant 0 : i32
    %c0_i32_1 = arith.constant 0 : i32
    return %c0_i32, %c0_i32_0 : i32, i32
  }
  func.func @transform_5(%arg0: i32) -> (i32, i32) {
    %c0_i32 = arith.constant 0 : i32
    %c0_i32_0 = arith.constant 0 : i32
    return %c0_i32, %arg0 : i32, i32
  }
}

</mosaic_0001>

<bundles_post_ra>
// kernel: tpu_custom_call.1
= control target key start
LH: loop header
LB: loop body
LE: loop exit
PB: predicated region body
PF: predicated region fallthrough
CT: control target
= control target key end

     0   :  { %vm247_vm0 = vcmask 130048   ;;  %v906_v4 = vmov 0   ;;  %s1240_s0 = inlined_call_operand.vmem [shape: f32[16,128], index: 0, kind: input, shape index: {}]   ;;  %s1241_s1 = inlined_call_operand.vmem [shape: f32[256,16], index: 1, kind: input, shape index: {}]   ;;  %s1242_s2 = inlined_call_operand.vmem [shape: f32[256,1], index: 2, kind: input, shape index: {}]   ;;  %s1243_s3 = inlined_call_operand.vmem [shape: f32[8,256], index: 3, kind: input, shape index: {}]   ;;  %s1244_s4 = inlined_call_operand.vmem [shape: f32[8,1], index: 4, kind: input, shape index: {}]   ;;  %s1245_s5 = inlined_call_operand.hbm [shape: f32[1,128], index: 5, kind: output, shape index: {}]  }
   0x1   :  { %v54_v0 = vld [vmem:[%s1240_s0 + $0x8] sm:$0xff]  ;;  %v53_v1 = vld [vmem:[%s1240_s0] sm:$0xff]  ;;  %881 = vset.pattern.permute.xlu1 %v906_v4  ;;  %v85_v5 = vld [vmem:[%s1242_s2 + $0xf0] sm:$0xff]  ;;  %880 = vset.pattern.permute.xlu0 %v906_v4 }
   0x2   :  { %v21_v2 = vld [vmem:[%s1241_s1] sm:$0xff]  ;;  %826 = vmatprep.subr.mxu0 %v54_v0  ;;  %v22_v3 = vld [vmem:[%s1241_s1 + $0x8] sm:$0xff]  ;;  %v23_v6 = vld [vmem:[%s1241_s1 + $0x10] sm:$0xff]  ;;  %239 = vperm.xlu1 %881, %v85_v5  }
   0x3   :  { %830 = vmatprep.mubr.msk.f32.mxu0 %vm247_vm0, %v21_v2  ;;  %827 = vmatpush3.msra.mxu0 %v54_v0  ;;  %v69_v7 = vld [vmem:[%s1242_s2 + $0x70] sm:$0xff]  ;;  %v24_v8 = vld [vmem:[%s1241_s1 + $0x18] sm:$0xff]  ;;  %v25_v9 = vld [vmem:[%s1241_s1 + $0x20] sm:$0xff] }
   0x4   :  { %828 = vmatprep.subr.mxu0 %v53_v1  ;;  %v68_v10 = vld [vmem:[%s1242_s2 + $0x68] sm:$0xff]  ;;  %v86_v11 = vld [vmem:[%s1242_s2 + $0xf8] sm:$0xff]  ;;  %v27_v14 = vld [vmem:[%s1241_s1 + $0x30] sm:$0xff] }
   0x5   :  { %829 = vmatpush3.msra.mxu0 %v53_v1  ;;  %244 = vperm.xlu0 %880, %v86_v11   ;;  %v26_v12 = vld [vmem:[%s1241_s1 + $0x28] sm:$0xff]  ;;  %v70_v13 = vld [vmem:[%s1242_s2 + $0x78] sm:$0xff]  ;;  %v67_v15 = vld [vmem:[%s1242_s2 + $0x60] sm:$0xff] }
   0x6   :  { %831 = vmatmul.mubr.msk.f32.vlgmr.msra.gmra.mxu0 %vm247_vm0, %v22_v3  ;;  %159 = vperm.xlu1 %881, %v69_v7   ;;  %v28_v16 = vld [vmem:[%s1241_s1 + $0x38] sm:$0xff]  ;;  %v84_v17 = vld [vmem:[%s1242_s2 + $0xe8] sm:$0xff]  ;;  %v29_v18 = vld [vmem:[%s1241_s1 + $0x40] sm:$0xff] }
   0x7   :  { %833 = vmatprep.mubr.msk.f32.mxu0 %vm247_vm0, %v23_v6  ;;  %v66_v19 = vld [vmem:[%s1242_s2 + $0x58] sm:$0xff]  ;;  %v30_v20 = vld [vmem:[%s1241_s1 + $0x48] sm:$0xff]  ;;  %v83_v21 = vld [vmem:[%s1242_s2 + $0xe0] sm:$0xff] }
   0x8   :  { %v31_v22 = vld [vmem:[%s1241_s1 + $0x50] sm:$0xff]  ;;  %v32_v24 = vld [vmem:[%s1241_s1 + $0x58] sm:$0xff] }
   0x9   :  { %164 = vperm.xlu0 %880, %v70_v13   ;;  %v65_v23 = vld [vmem:[%s1242_s2 + $0x50] sm:$0xff]  ;;  %v82_v25 = vld [vmem:[%s1242_s2 + $0xd8] sm:$0xff] }
   0xa   :  { %834 = vmatmul.mubr.msk.f32.gmra.mxu0 %vm247_vm0, %v24_v8  ;;  %154 = vperm.xlu1 %881, %v68_v10  }
   0xb   :  { %836 = vmatprep.mubr.msk.f32.mxu0 %vm247_vm0, %v25_v9 }
   0xd   :  { %234 = vperm.xlu0 %880, %v84_v17  }
   0xe   :  { %837 = vmatmul.mubr.msk.f32.gmra.mxu0 %vm247_vm0, %v26_v12  ;;  %149 = vperm.xlu1 %881, %v67_v15  }
   0xf   :  { %839 = vmatprep.mubr.msk.f32.mxu0 %vm247_vm0, %v27_v14 }
  0x11   :  { %229 = vperm.xlu0 %880, %v83_v21  }
  0x12   :  { %840 = vmatmul.mubr.msk.f32.gmra.mxu0 %vm247_vm0, %v28_v16  ;;  %144 = vperm.xlu1 %881, %v66_v19  }
  0x13   :  { %842 = vmatprep.mubr.msk.f32.mxu0 %vm247_vm0, %v29_v18 }
  0x16   :  { %843 = vmatmul.mubr.msk.f32.gmra.mxu0 %vm247_vm0, %v30_v20 }
  0x17   :  { %845 = vmatprep.mubr.msk.f32.mxu0 %vm247_vm0, %v31_v22 }
  0x18   :  { %10 = vsyncpa [#allocation3], 0  ;;  %v33_v26 = vld [vmem:[%s1241_s1 + $0x60] sm:$0xff]  ;;  %139 = vperm.xlu1 %881, %v65_v23   ;;  %v64_v27 = vld [vmem:[%s1242_s2 + $0x48] sm:$0xff]  ;;  %224 = vperm.xlu0 %880, %v82_v25  }
  0x19   :  { %v34_v28 = vld [vmem:[%s1241_s1 + $0x68] sm:$0xff]  ;;  %v81_v29 = vld [vmem:[%s1242_s2 + $0xd0] sm:$0xff]  ;;  %v63_v31 = vld [vmem:[%s1242_s2 + $0x40] sm:$0xff] }
  0x1a   :  { %846 = vmatmul.mubr.msk.f32.gmra.mxu0 %vm247_vm0, %v32_v24  ;;  %v35_v30 = vld [vmem:[%s1241_s1 + $0x70] sm:$0xff]  ;;  %v36_v32 = vld [vmem:[%s1241_s1 + $0x78] sm:$0xff]  ;;  %v80_v33 = vld [vmem:[%s1242_s2 + $0xc8] sm:$0xff] }
  0x1b   :  { %848 = vmatprep.mubr.msk.f32.mxu0 %vm247_vm0, %v33_v26  ;;  %v37_v34 = vld [vmem:[%s1241_s1 + $0x80] sm:$0xff]  ;;  %v62_v35 = vld [vmem:[%s1242_s2 + $0x38] sm:$0xff]  ;;  %v38_v36 = vld [vmem:[%s1241_s1 + $0x88] sm:$0xff] }
  0x1c   :  { %134 = vperm.xlu1 %881, %v64_v27   ;;  %219 = vperm.xlu0 %880, %v81_v29   ;;  %v79_v37 = vld [vmem:[%s1242_s2 + $0xc0] sm:$0xff]  ;;  %v39_v38 = vld [vmem:[%s1241_s1 + $0x90] sm:$0xff]  ;;  %v40_v40 = vld [vmem:[%s1241_s1 + $0x98] sm:$0xff] }
  0x1d   :  { %v61_v39 = vld [vmem:[%s1242_s2 + $0x30] sm:$0xff]  ;;  %v78_v41 = vld [vmem:[%s1242_s2 + $0xb8] sm:$0xff]  ;;  %v41_v42 = vld [vmem:[%s1241_s1 + $0xa0] sm:$0xff] }
  0x1e   :  { %849 = vmatmul.mubr.msk.f32.gmra.mxu0 %vm247_vm0, %v34_v28  ;;  %v60_v43 = vld [vmem:[%s1242_s2 + $0x28] sm:$0xff]  ;;  %v77_v45 = vld [vmem:[%s1242_s2 + $0xb0] sm:$0xff]  ;;  %v59_v47 = vld [vmem:[%s1242_s2 + $0x20] sm:$0xff] }
  0x1f   :  { %851 = vmatprep.mubr.msk.f32.mxu0 %vm247_vm0, %v35_v30  ;;  %v42_v44 = vld [vmem:[%s1241_s1 + $0xa8] sm:$0xff]  ;;  %v43_v46 = vld [vmem:[%s1241_s1 + $0xb0] sm:$0xff]  ;;  %v44_v48 = vld [vmem:[%s1241_s1 + $0xb8] sm:$0xff] }
  0x20   :  { %129 = vperm.xlu1 %881, %v63_v31   ;;  %214 = vperm.xlu0 %880, %v80_v33   ;;  %v76_v49 = vld [vmem:[%s1242_s2 + $0xa8] sm:$0xff]  ;;  %v45_v50 = vld [vmem:[%s1241_s1 + $0xc0] sm:$0xff]  ;;  %v58_v51 = vld [vmem:[%s1242_s2 + $0x18] sm:$0xff] }
  0x21   :  { %v46_v52 = vld [vmem:[%s1241_s1 + $0xc8] sm:$0xff]  ;;  %v75_v53 = vld [vmem:[%s1242_s2 + $0xa0] sm:$0xff]  ;;  %v47_v54 = vld [vmem:[%s1241_s1 + $0xd0] sm:$0xff] }
  0x22   :  { %852 = vmatmul.mubr.msk.f32.gmra.mxu0 %vm247_vm0, %v36_v32  ;;  %v57_v55 = vld [vmem:[%s1242_s2 + $0x10] sm:$0xff]  ;;  %v48_v56 = vld [vmem:[%s1241_s1 + $0xd8] sm:$0xff]  ;;  %v49_v58 = vld [vmem:[%s1241_s1 + $0xe0] sm:$0xff] }
  0x23   :  { %854 = vmatprep.mubr.msk.f32.mxu0 %vm247_vm0, %v37_v34  ;;  %v74_v57 = vld [vmem:[%s1242_s2 + $0x98] sm:$0xff]  ;;  %v56_v59 = vld [vmem:[%s1242_s2 + $0x8] sm:$0xff]  ;;  %v73_v61 = vld [vmem:[%s1242_s2 + $0x90] sm:$0xff] }
  0x24   :  { %124 = vperm.xlu1 %881, %v62_v35   ;;  %209 = vperm.xlu0 %880, %v79_v37   ;;  %v50_v60 = vld [vmem:[%s1241_s1 + $0xe8] sm:$0xff]  ;;  %v51_v62 = vld [vmem:[%s1241_s1 + $0xf0] sm:$0xff]  ;;  %v55_v63 = vld [vmem:[%s1242_s2] sm:$0xff] }
  0x25   :  { %v52_v0 = vld [vmem:[%s1241_s1 + $0xf8] sm:$0xff]  ;;  %v72_v1 = vld [vmem:[%s1242_s2 + $0x88] sm:$0xff]  ;;  %v71_v2 = vld [vmem:[%s1242_s2 + $0x80] sm:$0xff] }
  0x26   :  { %855 = vmatmul.mubr.msk.f32.gmra.mxu0 %vm247_vm0, %v38_v36  ;;  %v603_v3 = vld [vmem:[%s1244_s4] sm:$0xff]  ;;  %v602_v4 = vld [vmem:[%s1243_s3 + $0x8] sm:$0xff] }
  0x27   :  { %857 = vmatprep.mubr.msk.f32.mxu0 %vm247_vm0, %v39_v38  ;;  %673 = vmatprep.mubr.f32.mxu1 %v602_v4 }
  0x28   :  { %119 = vperm.xlu1 %881, %v61_v39   ;;  %204 = vperm.xlu0 %880, %v78_v41  }
  0x2a   :  { %858 = vmatmul.mubr.msk.f32.gmra.mxu0 %vm247_vm0, %v40_v40 }
  0x2b   :  { %860 = vmatprep.mubr.msk.f32.mxu0 %vm247_vm0, %v41_v42 }
  0x2c   :  { %114 = vperm.xlu1 %881, %v60_v43   ;;  %199 = vperm.xlu0 %880, %v77_v45  }
  0x2e   :  { %861 = vmatmul.mubr.msk.f32.gmra.mxu0 %vm247_vm0, %v42_v44 }
  0x2f   :  { %863 = vmatprep.mubr.msk.f32.mxu0 %vm247_vm0, %v43_v46 }
  0x30   :  { %109 = vperm.xlu1 %881, %v59_v47   ;;  %194 = vperm.xlu0 %880, %v76_v49  }
  0x32   :  { %864 = vmatmul.mubr.msk.f32.gmra.mxu0 %vm247_vm0, %v44_v48 }
  0x33   :  { %866 = vmatprep.mubr.msk.f32.mxu0 %vm247_vm0, %v45_v50 }
  0x34   :  { %104 = vperm.xlu1 %881, %v58_v51   ;;  %189 = vperm.xlu0 %880, %v75_v53  }
  0x36   :  { %867 = vmatmul.mubr.msk.f32.gmra.mxu0 %vm247_vm0, %v46_v52 }
  0x37   :  { %869 = vmatprep.mubr.msk.f32.mxu0 %vm247_vm0, %v47_v54 }
  0x38   :  { %99 = vperm.xlu1 %881, %v57_v55   ;;  %184 = vperm.xlu0 %880, %v74_v57  }
  0x3a   :  { %870 = vmatmul.mubr.msk.f32.gmra.mxu0 %vm247_vm0, %v48_v56 }
  0x3b   :  { %872 = vmatprep.mubr.msk.f32.mxu0 %vm247_vm0, %v49_v58 }
  0x3c   :  { %94 = vperm.xlu1 %881, %v56_v59   ;;  %179 = vperm.xlu0 %880, %v73_v61  }
  0x3e   :  { %873 = vmatmul.mubr.msk.f32.gmra.mxu0 %vm247_vm0, %v50_v60 }
  0x3f   :  { %875 = vmatprep.mubr.msk.f32.mxu0 %vm247_vm0, %v51_v62 }
  0x40   :  { %89 = vperm.xlu1 %881, %v55_v63   ;;  %174 = vperm.xlu0 %880, %v72_v1  }
  0x42   :  { %876 = vmatmul.mubr.msk.f32.gmra.mxu0 %vm247_vm0, %v52_v0 }
  0x44   :  { %169 = vperm.xlu0 %880, %v71_v2  }
  0x48   :  { %606 = vperm.xlu0 %880, %v603_v3  }
  0x7d   :  { %v240_v5 = vpop.permute.xlu1 %239 }
  0x80   :  { %v245_v6 = vpop.permute.xlu0 %244 }
  0x81   :  { %v160_v9 = vpop.permute.xlu1 %159 }
  0x84   :  { %v165_v10 = vpop.permute.xlu0 %164 }
  0x85   :  { %v155_v14 = vpop.permute.xlu1 %154 }
  0x88   :  { %v235_v15 = vpop.permute.xlu0 %234 }
  0x89   :  { %v150_v19 = vpop.permute.xlu1 %149 }
  0x8c   :  { %v230_v20 = vpop.permute.xlu0 %229 }
  0x8d   :  { %v145_v24 = vpop.permute.xlu1 %144 }
  0x93   :  { %v225_v25 = vpop.permute.xlu0 %224  ;;  %v140_v29 = vpop.permute.xlu1 %139 }
  0x97   :  { %v220_v30 = vpop.permute.xlu0 %219  ;;  %v135_v34 = vpop.permute.xlu1 %134 }
  0x9b   :  { %v215_v35 = vpop.permute.xlu0 %214  ;;  %v130_v39 = vpop.permute.xlu1 %129 }
  0x9f   :  { %v210_v40 = vpop.permute.xlu0 %209  ;;  %v125_v44 = vpop.permute.xlu1 %124 }
  0xa3   :  { %v205_v45 = vpop.permute.xlu0 %204  ;;  %v1208_v49 = vpop.permute.xlu1 %119 }
  0xa7   :  { %v200_v50 = vpop.permute.xlu0 %199  ;;  %v1210_v54 = vpop.permute.xlu1 %114 }
  0xab   :  { %v195_v55 = vpop.permute.xlu0 %194  ;;  %v1212_v62 = vpop.permute.xlu1 %109 }
  0xaf   :  { %v190_v2 = vpop.permute.xlu0 %189 }
  0xc6   :  { %v1174_v7 = vpop.f32.mrf.mxu0 }
  0xc7   :  { %1246 = vst [vmem:[#allocation5_spill] sm:$0xff] %v1174_v7 }
  0xc8   :  { %v1176_v8 = vpop.f32.mrf.mxu0 }
  0xc9   :  { %1247 = vst [vmem:[#allocation6_spill] sm:$0xff] %v1176_v8 }
  0xca   :  { %v1178_v11 = vpop.f32.mrf.mxu0 }
  0xcc   :  { %v1180_v12 = vpop.f32.mrf.mxu0 }
  0xcd   :  { %1248 = vst [vmem:[#allocation7_spill] sm:$0xff] %v1180_v12 }
  0xce   :  { %v1182_v13 = vpop.f32.mrf.mxu0 }
  0xd0   :  { %v1184_v16 = vpop.f32.mrf.mxu0 }
  0xd2   :  { %v1186_v17 = vpop.f32.mrf.mxu0 }
  0xd4   :  { %v1188_v18 = vpop.f32.mrf.mxu0 }
  0xd6   :  { %v1190_v21 = vpop.f32.mrf.mxu0 }
  0xd8   :  { %v1192_v22 = vpop.f32.mrf.mxu0 }
  0xda   :  { %v847_v23 = vpop.f32.mrf.mxu0 }
  0xdc   :  { %v460_v26 = vpop.f32.mrf.mxu0 }
  0xde   :  { %v850_v27 = vpop.f32.mrf.mxu0 }
  0xdf   :  { %v476_v3 = vadd.f32 %v850_v27, %v155_v14 }
  0xe0   :  { %v470_v28 = vpop.f32.mrf.mxu0 }
  0xe1   :  { %v471_v7 = vadd.f32 %v470_v28, %v150_v19  ;;  %v456_v19 = vadd.f32 %v1190_v21, %v135_v34  ;;  %v441_v34 = vadd.f32 %v1188_v18, %v1208_v49 }
  0xe2   :  { %v853_v31 = vpop.f32.mrf.mxu0 }
  0xe3   :  { %v486_v57 = vadd.f32 %v853_v31, %v165_v10  ;;  %v105_v31 = vpop.permute.xlu1 %104  ;;  %v581_v14 = vmax.f32 %v471_v7, 0.0  ;;  %v446_v7 = vadd.f32 %v1186_v17, %v125_v44  ;;  %v575_v18 = vmax.f32 %v441_v34, 0.0 }
  0xe4   :  { %v480_v32 = vpop.f32.mrf.mxu0  ;;  %v426_v49 = vadd.f32 %v1178_v11, %v105_v31 }
  0xe5   :  { %v481_v60 = vadd.f32 %v480_v32, %v160_v9  ;;  %v584_v4 = vmax.f32 %v486_v57, 0.0  ;;  %v582_v9 = vmax.f32 %v476_v3, 0.0  ;;  %v576_v17 = vmax.f32 %v446_v7, 0.0 }
  0xe6   :  { %v1194_v33 = vpop.f32.mrf.mxu0 }
  0xe7   :  { %1249 = vst [vmem:[#allocation8_spill] sm:$0xff] %v1194_v33  ;;  %v583_v33 = vmax.f32 %v481_v60, 0.0 }
  0xe8   :  { %v1196_v36 = vpop.f32.mrf.mxu0 }
  0xe9   :  { %1250 = vst [vmem:[#allocation9_spill] sm:$0xff] %v1196_v36 }
  0xea   :  { %v1198_v37 = vpop.f32.mrf.mxu0 }
  0xec   :  { %v1200_v38 = vpop.f32.mrf.mxu0 }
  0xee   :  { %v1202_v41 = vpop.f32.mrf.mxu0 }
  0xf0   :  { %v1204_v42 = vpop.f32.mrf.mxu0  ;;  %v1254_v11 = vld [vmem:[#allocation9_spill] sm:$0xff] }
  0xf1   :  { %v511_v44 = vadd.f32 %v1204_v42, %v190_v2  ;;  %v1251_v42 = vld [vmem:[#allocation7_spill] sm:$0xff] }
  0xf2   :  { %v865_v43 = vpop.f32.mrf.mxu0 }
  0xf4   :  { %v1206_v46 = vpop.f32.mrf.mxu0 }
  0xf5   :  { %v521_v21 = vadd.f32 %v1206_v46, %v200_v50  ;;  %v431_v46 = vadd.f32 %v1184_v16, %v1212_v62 }
  0xf6   :  { %v868_v47 = vpop.f32.mrf.mxu0 }
  0xf8   :  { %v530_v48 = vpop.f32.mrf.mxu0 }
  0xfa   :  { %v871_v51 = vpop.f32.mrf.mxu0 }
  0xfb   :  { %v546_v12 = vadd.f32 %v871_v51, %v225_v25  ;;  %v531_v25 = vadd.f32 %v530_v48, %v210_v40  ;;  %v436_v40 = vadd.f32 %v1182_v13, %v1210_v54  ;;  %v589_v51 = vmax.f32 %v511_v44, 0.0 }
  0xfc   :  { %v540_v52 = vpop.f32.mrf.mxu0  ;;  %v573_v54 = vmax.f32 %v431_v46, 0.0 }
  0xfd   :  { %v541_v32 = vadd.f32 %v540_v52, %v220_v30  ;;  %v596_v27 = vmax.f32 %v546_v12, 0.0  ;;  %v526_v30 = vadd.f32 %v865_v43, %v205_v45  ;;  %v591_v45 = vmax.f32 %v521_v21, 0.0 }
  0xfe   :  { %v874_v53 = vpop.f32.mrf.mxu0  ;;  %v574_v13 = vmax.f32 %v436_v40, 0.0 }
  0xff   :  { %v556_v63 = vadd.f32 %v874_v53, %v235_v15  ;;  %v461_v53 = vadd.f32 %v460_v26, %v140_v29  ;;  %v578_v26 = vmax.f32 %v456_v19, 0.0  ;;  %v593_v29 = vmax.f32 %v531_v25, 0.0 }
 0x100   :  { %v550_v56 = vpop.f32.mrf.mxu0 }
 0x101   :  { %v551_v8 = vadd.f32 %v550_v56, %v230_v20  ;;  %v598_v10 = vmax.f32 %v556_v63, 0.0  ;;  %v536_v20 = vadd.f32 %v868_v47, %v215_v35 }
 0x102   :  { %v877_v58 = vpop.f32.mrf.mxu0 }
 0x103   :  { %v566_v59 = vadd.f32 %v877_v58, %v245_v6  ;;  %v466_v6 = vadd.f32 %v847_v23, %v145_v24  ;;  %v597_v15 = vmax.f32 %v551_v8, 0.0  ;;  %v451_v23 = vadd.f32 %v1192_v22, %v130_v39  ;;  %v100_v8 = vpop.permute.xlu1 %99 }
 0x104   :  { %v560_v61 = vpop.f32.mrf.mxu0  ;;  %v579_v24 = vmax.f32 %v461_v53, 0.0  ;;  %v516_v22 = vadd.f32 %v1202_v41, %v195_v55  ;;  %v592_v39 = vmax.f32 %v526_v30, 0.0  ;;  %v421_v52 = vadd.f32 %v1251_v42, %v100_v8  ;;  %v1252_v55 = vld [vmem:[#allocation8_spill] sm:$0xff] }
 0x105   :  { %v561_v0 = vadd.f32 %v560_v61, %v240_v5  ;;  %v600_v1 = vmax.f32 %v566_v59, 0.0  ;;  %v185_v5 = vpop.permute.xlu0 %184  ;;  %v580_v28 = vmax.f32 %v466_v6, 0.0  ;;  %v577_v35 = vmax.f32 %v451_v23, 0.0 }
 0x106   :  { %v506_v41 = vadd.f32 %v1198_v37, %v185_v5  ;;  %v590_v48 = vmax.f32 %v516_v22, 0.0  ;;  %v1253_v37 = vld [vmem:[#allocation5_spill] sm:$0xff]  ;;  %v572_v59 = vmax.f32 %v426_v49, 0.0 }
 0x107   :  { %v599_v36 = vmax.f32 %v561_v0, 0.0  ;;  %791 = vmatprep.subr.mxu1 %v600_v1  ;;  %v95_v43 = vpop.permute.xlu1 %94  ;;  %v571_v0 = vmax.f32 %v421_v52, 0.0 }
 0x108   :  { %792 = vmatpush3.msra.mxu1 %v584_v4  ;;  %v588_v57 = vmax.f32 %v506_v41, 0.0  ;;  %v416_v58 = vadd.f32 %v1253_v37, %v95_v43 }
 0x109   :  { %793 = vmatprep.subr.mxu1 %v599_v36  ;;  %v595_v36 = vmax.f32 %v541_v32, 0.0  ;;  %v180_v12 = vpop.permute.xlu0 %179 }
 0x10a   :  { %794 = vmatpush3.msra.mxu1 %v583_v33  ;;  %v594_v33 = vmax.f32 %v536_v20, 0.0  ;;  %v501_v50 = vadd.f32 %v1200_v38, %v180_v12  ;;  %v1255_v38 = vld [vmem:[#allocation6_spill] sm:$0xff]  ;;  %v570_v2 = vmax.f32 %v416_v58, 0.0  ;;  %v687_v20 = vlaneseq }
 0x10b   :  { %795 = vmatprep.subr.mxu1 %v598_v10  ;;  %v90_v16 = vpop.permute.xlu1 %89  ;;  %v601_v10 = vld [vmem:[%s1243_s3] sm:$0xff]  ;;  %s907_s3 = smov [#allocation2]  }
 0x10c   :  { %796 = vmatpush3.msra.mxu1 %v582_v9  ;;  %v587_v62 = vmax.f32 %v501_v50, 0.0  ;;  %v411_v63 = vadd.f32 %v1255_v38, %v90_v16  ;;  %s717_s23 = sshll.u32 %s907_s3, 4  ;;  %s718_s23 = int_to_ptr.vmem [resolvable:$true] %s717_s23 }
 0x10d   :  { %797 = vmatprep.subr.mxu1 %v597_v15  ;;  %v175_v47 = vpop.permute.xlu0 %174  ;;  %s884_s24 = scalar_lea.vmem %s718_s23, 16  ;;  %s888_s25 = scalar_lea.vmem %s718_s23, 32 }
 0x10e   :  { %798 = vmatpush3.msra.mxu1 %v581_v14  ;;  %v496_v56 = vadd.f32 %v1252_v55, %v175_v47  ;;  %v569_v4 = vmax.f32 %v411_v63, 0.0  ;;  %p885_p0 = scmp.ne.s32.totalorder %s718_s23, %s884_s24  ;;  %p889_p1 = scmp.lt.s32.totalorder %s718_s23, %s718_s23 }
 0x10f   :  { %799 = vmatprep.subr.mxu1 %v596_v27  ;;  %p890_p2 = scmp.lt.s32.totalorder %s888_s25, %s884_s24 }
 0x110   :  { %800 = vmatpush3.msra.mxu1 %v580_v28  ;;  %v586_v1 = vmax.f32 %v496_v56, 0.0  ;;  %v688_v28 = vshrl.u32 %v687_v20, 7 }
 0x111   :  { %801 = vmatprep.subr.mxu1 %v595_v36  ;;  %v170_v60 = vpop.permute.xlu0 %169  ;;  %p891_p3 = por %p890_p2, %p889_p1 }
 0x112   :  { %802 = vmatpush3.msra.mxu1 %v579_v24  ;;  %v491_v61 = vadd.f32 %v1254_v11, %v170_v60  ;;  %vm689_vm1 = vcmp.lt.s32.totalorder %v688_v28, 5 }
 0x113   :  { %803 = vmatprep.subr.mxu1 %v594_v33  ;;  %p892_p4 = pnand %p891_p3, %p885_p0 }
 0x114   :  { %804 = vmatpush3.msra.mxu1 %v578_v26  ;;  %v585_v3 = vmax.f32 %v491_v61, 0.0 }
 0x115   :  { %805 = vmatprep.subr.mxu1 %v593_v29  ;;  %v607_v32 = vpop.permute.xlu0 %606 }
 0x116   :  { %806 = vmatpush3.msra.mxu1 %v577_v35 }
 0x117   :  { %807 = vmatprep.subr.mxu1 %v592_v39 }
 0x118   :  { %808 = vmatpush3.msra.mxu1 %v576_v17 }
 0x119   :  { %809 = vmatprep.subr.mxu1 %v591_v45 }
 0x11a   :  { %810 = vmatpush3.msra.mxu1 %v575_v18 }
 0x11b   :  { %811 = vmatprep.subr.mxu1 %v590_v48 }
 0x11c   :  { %812 = vmatpush3.msra.mxu1 %v574_v13 }
 0x11d   :  { %813 = vmatprep.subr.mxu1 %v589_v51 }
 0x11e   :  { %814 = vmatpush3.msra.mxu1 %v573_v54 }
 0x11f   :  { %815 = vmatprep.subr.mxu1 %v588_v57 }
 0x120   :  { %816 = vmatpush3.msra.mxu1 %v572_v59 }
 0x121   :  { %817 = vmatprep.subr.mxu1 %v587_v62 }
 0x122   :  { %818 = vmatpush3.msra.mxu1 %v571_v0 }
 0x123   :  { %819 = vmatprep.subr.mxu1 %v586_v1 }
 0x124   :  { %820 = vmatpush3.msra.mxu1 %v570_v2 }
 0x125   :  { %821 = vmatprep.subr.mxu1 %v585_v3 }
 0x126   :  { %822 = vmatpush3.msra.mxu1 %v569_v4 }
 0x127   :  { %674 = vmatmul.mubr.f32.vlgmr.msra.gmra.mxu1 %v601_v10 }
 0x1e7   :  { %v823_v6 = vpop.f32.mrf.mxu1 }
 0x1e9   :  { %v824_v9 = vpop.f32.mrf.mxu1 }
 0x1ea   :  { %v825_v31 = vadd.f32 %v824_v9, %v823_v6 }
 0x1ec   :  { %v676_v15 = vadd.f32 %v825_v31, %v607_v32 }
 0x1ee   :  { %v679_v5 = vrot.slane %v676_v15, 4 }
 0x1f0   :  { %v680_v53 = vadd.f32 %v679_v5, %v676_v15 }
 0x1f2   :  { %v681_v14 = vrot.slane %v680_v53, 2 }
 0x1f4   :  { %v682_v27 = vadd.f32 %v681_v14, %v680_v53 }
 0x1f6   :  { %v683_v19 = vrot.slane %v682_v27, 1 }
 0x1f8   :  { %v684_v25 = vadd.f32 %v683_v19, %v682_v27 }
 0x1fa   :  { %v686_v36 = vmul.f32 0.2, %v684_v25 }
 0x1fc   :  { %v690_v23 = vsub.f32 %v676_v15, %v686_v36 }
 0x1fe   :  { %v691_v24 = vsel %vm689_vm1, %v690_v23, 0.0 }
 0x1ff   :  { %v692_v8 = vmul.f32 %v691_v24, %v691_v24 }
 0x201   :  { %v693_v30 = vrot.slane %v692_v8, 4 }
 0x203   :  { %v694_v33 = vadd.f32 %v693_v30, %v692_v8 }
 0x205   :  { %v695_v7 = vrot.slane %v694_v33, 2 }
 0x207   :  { %v696_v26 = vadd.f32 %v695_v7, %v694_v33 }
 0x209   :  { %v697_v12 = vrot.slane %v696_v26, 1 }
 0x20b   :  { %v698_v21 = vadd.f32 %v697_v12, %v696_v26 }
 0x20d   :  { %v700_v29 = vmul.f32 0.25, %v698_v21 }
 0x20f   :  { %882 = vrsqrt.f32 %v700_v29  ;;  %vm703_vm2 = vcmp.eq.f32.partialorder %v700_v29, inf  ;;  %v706_v22 = vand.u32 2147483648, %v700_v29  ;;  %vm705_vm3 = vcmp.eq.f32.partialorder %v700_v29, 0.0 }
 0x21c   :  { %v883_v34 = vpop.eup %882 }
 0x21d   :  { %v702_v35 = vmul.f32 %v883_v34, %v700_v29 }
 0x21f   :  { %v704_v39 = vsel %vm703_vm2, %v700_v29, %v702_v35 }
 0x220   :  { %v707_v40 = vsel %vm705_vm3, %v706_v22, %v704_v39 }
 0x221   :  { %v708_v17 = vmul.f32 2.0, %v707_v40 }
 0x223   :  { %v709_v43 = vsub.f32 %v686_v36, %v708_v17 }
 0x225   :  { %710 = vst [vmem:[#allocation2] sm:$0x1] %v709_v43 }
 0x226   :  { %895 = shalt.err (!%p892_p4)
}
 0x227   :  { %720 = dma.vmem_to_hbm [thread:$0]  %s718_s23, 16, %s1245_s5, [#allocation3]  }
 0x228   :  { %904 = dma.done.wait [#allocation3], 16  }
 0x229   :  { %905 = vsyncadd [#allocation3], 4294967280 }
 0x22a   :  { %724 = vsyncpa [#allocation3], 1 }

</bundles_post_ra>
